<compile_context>
chip_gen: v7x
topology: tpu7x:2x2x1
jax: 0.10.0
libtpu: 0.0.40
codegen_flags: <defaults>
</compile_context>

<pallas_src>
import functools

import jax
import jax.numpy as jnp
from jax.experimental import pallas as pl
from jax.experimental.pallas import tpu as pltpu

MAX_SPLITS = 2                    # megacore split on v7x; harmless on v5e/v6e
TARGET_BLOCK_ELEMS = 4096 * 128   # ~2 MiB per f32 input block


def _sq_diff_kernel(o_ref, m_ref, out_ref, *, row_tile, lanes,
                    tiles_per_split, rows_total, needs_mask):
    s = pl.program_id(0)   # split (parallel)
    j = pl.program_id(1)   # tile within split (sequential reduction)

    @pl.when(j == 0)
    def _():
        out_ref[...] = jnp.zeros_like(out_ref)

    d = o_ref[...].astype(jnp.float32) - m_ref[...].astype(jnp.float32)
    sq = d * d

    if needs_mask:
        # Mask rows past the end of the slab, using the *logical* (unclamped)
        # tile index so duplicated clamped tiles contribute exactly zero.
        start_row = (s * tiles_per_split + j) * row_tile
        row_ids = jax.lax.broadcasted_iota(jnp.int32, (row_tile, lanes), 0)
        valid = (start_row + row_ids) < rows_total
        sq = jnp.where(valid, sq, 0.0)

    # Fold the (row_tile, lanes) block into the vreg-shaped accumulator with
    # pure VPU adds; no per-step cross-lane (XLU) reduce.
    out_ref[...] += jnp.sum(sq.reshape(row_tile // 8, 8, lanes), axis=0)[None]


def psnr_loss(origin, merged, max_pixel=1.0):
    assert origin.shape == merged.shape
    n_elems = int(origin.size)

    # Widest lane count dividing the element count (lane-dense, no pad copy).
    lanes = 128
    for lw in (1024, 512, 256, 128):
        if n_elems % lw == 0:
            lanes = lw
            break

    flat_o = origin.reshape(-1)
    flat_m = merged.reshape(-1)
    pad = (-n_elems) % lanes
    if pad:
        # Rare path (count not a multiple of 128): identical zero pad of both
        # inputs contributes 0 to the squared-diff sum.
        flat_o = jnp.pad(flat_o, (0, pad))
        flat_m = jnp.pad(flat_m, (0, pad))
    rows = flat_o.size // lanes
    o2 = flat_o.reshape(rows, lanes)
    m2 = flat_m.reshape(rows, lanes)

    # Row tile: large (amortize per-step overhead), multiple of 8, capped so
    # 2 inputs x 2 pipeline buffers stay ~8 MiB for f32 (inside v5e's 16 MiB
    # default scoped VMEM and far under v7x's 64 MiB physical VMEM).
    max_rows = max(8, (TARGET_BLOCK_ELEMS // lanes) // 8 * 8)
    rows_r8 = ((rows + 7) // 8) * 8
    row_tile = min(max_rows, rows_r8)

    total_tiles = pl.cdiv(rows, row_tile)
    num_splits = min(MAX_SPLITS, total_tiles)   # no dead grid steps for tiny inputs
    tiles_per_split = pl.cdiv(total_tiles, num_splits)
    grid = (num_splits, tiles_per_split)

    # Static: do all logical tiles exactly cover the slab (no ragged tail, no
    # duplicated clamped tiles)?  If so, compile out the mask entirely.
    needs_mask = (num_splits * tiles_per_split * row_tile) != rows

    def in_map(s, j):
        # Clamp so the DMA never starts fully out of bounds; duplicated tiles
        # are fully masked inside the kernel.
        return (jnp.minimum(s * tiles_per_split + j, total_tiles - 1), 0)

    kernel = functools.partial(
        _sq_diff_kernel,
        row_tile=row_tile,
        lanes=lanes,
        tiles_per_split=tiles_per_split,
        rows_total=rows,
        needs_mask=needs_mask,
    )

    itemsize = jnp.dtype(origin.dtype).itemsize
    partials = pl.pallas_call(
        kernel,
        out_shape=jax.ShapeDtypeStruct((num_splits, 8, lanes), jnp.float32),
        grid_spec=pltpu.PrefetchScalarGridSpec(
            num_scalar_prefetch=0,
            grid=grid,
            in_specs=[
                pl.BlockSpec((row_tile, lanes), in_map),
                pl.BlockSpec((row_tile, lanes), in_map),
            ],
            out_specs=pl.BlockSpec((1, 8, lanes), lambda s, j: (s, 0, 0)),
        ),
        compiler_params=pltpu.CompilerParams(
            dimension_semantics=("parallel", "arbitrary"),
        ),
        cost_estimate=pl.CostEstimate(
            flops=3 * n_elems,
            transcendentals=0,
            bytes_accessed=2 * n_elems * itemsize + num_splits * 8 * lanes * 4,
        ),
    )(o2, m2)

    # Finalize: one cross-lane reduce of a tiny array + scalar epilogue.
    total = jnp.sum(partials)
    mse = total / jnp.float32(n_elems)
    psnr = jnp.where(
        mse == 0.0,
        jnp.float32(jnp.inf),
        20.0 * jnp.log10(jnp.float32(max_pixel) / jnp.sqrt(mse)),
    )
    return psnr


if __name__ == "__main__":
    key = jax.random.PRNGKey(0)
    k1, k2 = jax.random.split(key)
    # Small NCHW inputs consistent with an image PSNR loss.
    origin = jax.random.uniform(k1, (2, 4, 16, 16), dtype=jnp.float32)
    merged = jax.random.uniform(k2, (2, 4, 16, 16), dtype=jnp.float32)

    psnr = psnr_loss(origin, merged, max_pixel=1.0)
    jax.block_until_ready(psnr)

    # Reference check in plain JAX.
    mse_ref = jnp.mean((origin - merged) ** 2)
    psnr_ref = 20.0 * jnp.log10(1.0 / jnp.sqrt(mse_ref))
    assert jnp.allclose(psnr, psnr_ref, rtol=1e-5, atol=1e-5), (psnr, psnr_ref)

    # Sanity-check the mse==0 branch (returns +inf like the PyTorch module).
    psnr_inf = psnr_loss(origin, origin, max_pixel=1.0)
    jax.block_until_ready(psnr_inf)
    assert jnp.isinf(psnr_inf), psnr_inf

    print("KERNEL_OK")
</pallas_src>

<mosaic_0001>
module attributes {stable_mosaic.version = 11 : i64} {
  func.func @_sq_diff_kernel(%arg0: i32, %arg1: i32, %arg2: memref<8x1024xf32, #tpu.memory_space<vmem>>, %arg3: memref<8x1024xf32, #tpu.memory_space<vmem>>, %arg4: memref<1x8x1024xf32, #tpu.memory_space<vmem>>) attributes {dimension_semantics = [#tpu.dimension_semantics<parallel>, #tpu.dimension_semantics<arbitrary>], iteration_bounds = array<i64: 1, 1>, scalar_prefetch = 0 : i64, scratch_operands = 0 : i64, tpu.core_type = #tpu.core_type<tc>, window_params = [{transform_indices = @transform_0, window_bounds = array<i64: 8, 1024>}, {transform_indices = @transform_1, window_bounds = array<i64: 8, 1024>}, {transform_indices = @transform_2, window_bounds = array<i64: 1, 8, 1024>}]} {
    %c0_i32 = arith.constant 0 : i32
    %0 = arith.cmpi eq, %arg1, %c0_i32 : i32
    %1 = arith.extui %0 : i1 to i32
    %c0_i32_0 = arith.constant 0 : i32
    %2 = arith.cmpi ne, %1, %c0_i32_0 : i32
    scf.if %2 {
      %cst_11 = arith.constant 0.000000e+00 : f32
      %23 = vector.broadcast %cst_11 : f32 to vector<1x8x1024xf32>
      %c0_12 = arith.constant 0 : index
      %c0_13 = arith.constant 0 : index
      %c0_14 = arith.constant 0 : index
      %24 = vector.load %arg4[%c0_12, %c0_13, %c0_14] : memref<1x8x1024xf32, #tpu.memory_space<vmem>>, vector<1x8x1024xf32>
      tpu.vector_store %arg4[%c0_12, %c0_13, %c0_14], %23 {strides = array<i32>} : memref<1x8x1024xf32, #tpu.memory_space<vmem>>, vector<1x8x1024xf32>,
    } else {
    }
    %c0 = arith.constant 0 : index
    %c0_1 = arith.constant 0 : index
    %3 = vector.load %arg2[%c0, %c0_1] : memref<8x1024xf32, #tpu.memory_space<vmem>>, vector<8x1024xf32>
    %c0_2 = arith.constant 0 : index
    %c0_3 = arith.constant 0 : index
    %4 = vector.load %arg3[%c0_2, %c0_3] : memref<8x1024xf32, #tpu.memory_space<vmem>>, vector<8x1024xf32>
    %5 = arith.subf %3, %4 : vector<8x1024xf32>
    %6 = arith.mulf %5, %5 : vector<8x1024xf32>
    %c1_i32 = arith.constant 1 : i32
    %7 = arith.muli %arg0, %c1_i32 : i32
    %8 = arith.addi %7, %arg1 : i32
    %c8_i32 = arith.constant 8 : i32
    %9 = arith.muli %8, %c8_i32 : i32
    %10 = tpu.iota {dimensions = array<i32: 0>} : vector<8x1024xi32>
    %11 = vector.broadcast %9 : i32 to vector<8x1024xi32>
    %12 = arith.addi %11, %10 : vector<8x1024xi32>
    %c2_i32 = arith.constant 2 : i32
    %13 = vector.broadcast %c2_i32 : i32 to vector<8x1024xi32>
    %14 = arith.cmpi slt, %12, %13 : vector<8x1024xi32>
    %cst = arith.constant 0.000000e+00 : f32
    %15 = vector.broadcast %cst : f32 to vector<8x1024xf32>
    %16 = arith.select %14, %6, %15 : vector<8x1024xi1>, vector<8x1024xf32>
    %c0_4 = arith.constant 0 : index
    %c0_5 = arith.constant 0 : index
    %c0_6 = arith.constant 0 : index
    %17 = vector.load %arg4[%c0_4, %c0_5, %c0_6] : memref<1x8x1024xf32, #tpu.memory_space<vmem>>, vector<1x8x1024xf32>
    %18 = vector.shape_cast %16 : vector<8x1024xf32> to vector<1x8x1024xf32>
    %cst_7 = arith.constant dense<0.000000e+00> : vector<8x1024xf32>
    %19 = vector.multi_reduction <add>, %18, %cst_7 [0] : vector<1x8x1024xf32> to vector<8x1024xf32>
    %20 = vector.shape_cast %19 : vector<8x1024xf32> to vector<1x8x1024xf32>
    %21 = arith.addf %17, %20 : vector<1x8x1024xf32>
    %c0_8 = arith.constant 0 : index
    %c0_9 = arith.constant 0 : index
    %c0_10 = arith.constant 0 : index
    %22 = vector.load %arg4[%c0_8, %c0_9, %c0_10] : memref<1x8x1024xf32, #tpu.memory_space<vmem>>, vector<1x8x1024xf32>
    tpu.vector_store %arg4[%c0_8, %c0_9, %c0_10], %21 {strides = array<i32>} : memref<1x8x1024xf32, #tpu.memory_space<vmem>>, vector<1x8x1024xf32>,
    return
  }
  func.func @transform_0(%arg0: i32, %arg1: i32) -> (i32, i32) {
    %c1_i32 = arith.constant 1 : i32
    %0 = arith.muli %arg0, %c1_i32 : i32
    %1 = arith.addi %0, %arg1 : i32
    %c0_i32 = arith.constant 0 : i32
    %2 = arith.minsi %1, %c0_i32 : i32
    %c0_i32_0 = arith.constant 0 : i32
    %c0_i32_1 = arith.constant 0 : i32
    return %2, %c0_i32_0 : i32, i32
  }
  func.func @transform_1(%arg0: i32, %arg1: i32) -> (i32, i32) {
    %c1_i32 = arith.constant 1 : i32
    %0 = arith.muli %arg0, %c1_i32 : i32
    %1 = arith.addi %0, %arg1 : i32
    %c0_i32 = arith.constant 0 : i32
    %2 = arith.minsi %1, %c0_i32 : i32
    %c0_i32_0 = arith.constant 0 : i32
    %c0_i32_1 = arith.constant 0 : i32
    return %2, %c0_i32_0 : i32, i32
  }
  func.func @transform_2(%arg0: i32, %arg1: i32) -> (i32, i32, i32) {
    %c0_i32 = arith.constant 0 : i32
    %c0_i32_0 = arith.constant 0 : i32
    %c0_i32_1 = arith.constant 0 : i32
    return %arg0, %c0_i32, %c0_i32_0 : i32, i32, i32
  }
}

</mosaic_0001>

<bundles_post_ra>
// kernel: tpu_custom_call.1
= control target key start
LH: loop header
LB: loop body
LE: loop exit
PB: predicated region body
PF: predicated region fallthrough
CT: control target
= control target key end

     0   :  { %7 = vsyncpa [#allocation3], 0  ;;  %s433_s0 = inlined_call_operand.hbm [shape: f32[2,1024], index: 0, kind: input, shape index: {}]   ;;  %s434_s1 = inlined_call_operand.hbm [shape: f32[2,1024], index: 1, kind: input, shape index: {}]   ;;  %s435_s2 = inlined_call_operand.hbm [shape: f32[1,8,1024], index: 2, kind: output, shape index: {}]  }
   0x1   :  { %8 = vsyncpa [#allocation6], 0 }
   0x2   :  { %9 = vsyncpa [#allocation4], 0 }
   0x3   :  { %21 = vsyncadd [#allocation3], 768  ;;  %s356_s9 = smov [#allocation2]   ;;  %s284_s13 = scalar_lea.hbm %s433_s0, 256 }
   0x4   :  { %s27_s10 = sshll.u32 %s356_s9, 4  ;;  %p285_p0 = scmp.ne.s32.totalorder %s433_s0, %s284_s13  ;;  %s28_s10 = int_to_ptr.vmem [resolvable:$true] %s27_s10 }
   0x5   :  { %p288_p1 = scmp.lt.u32.totalorder %s284_s13, %s433_s0 }
   0x7   :  { %p290_p2 = pnand %p288_p1, %p285_p0 }
   0x9   :  { %293 = shalt.err (!%p290_p2)
}
   0xa   :  { %s294_s18 = scalar_lea.vmem %s28_s10, 256  ;;  %s298_s19 = scalar_lea.vmem %s28_s10, 1024 }
   0xb   :  { %p295_p3 = scmp.ne.s32.totalorder %s28_s10, %s294_s18  ;;  %p299_p4 = scmp.lt.s32.totalorder %s28_s10, %s28_s10 }
   0xc   :  { %p300_p5 = scmp.lt.s32.totalorder %s298_s19, %s294_s18 }
   0xe   :  { %p301_p6 = por %p300_p5, %p299_p4 }
  0x10   :  { %p302_p7 = pnand %p301_p6, %p295_p3 }
  0x12   :  { %305 = shalt.err (!%p302_p7)
}
  0x13   :  { %s357_s20 = smov 256   ;;  %s358_s21 = smov 16  }
  0x14   :  { %33 = dma.hbm_to_vmem [thread:$0]  %s433_s0, 256, %s28_s10, [#allocation3], %s357_s20, %s357_s20, %s358_s21  }
  0x15   :  { %45 = vsyncadd [#allocation6], 768  ;;  %s359_s24 = smov [#allocation5]   ;;  %s306_s28 = scalar_lea.hbm %s434_s1, 256 }
  0x16   :  { %s51_s25 = sshll.u32 %s359_s24, 4  ;;  %p307_p8 = scmp.ne.s32.totalorder %s434_s1, %s306_s28  ;;  %s52_s25 = int_to_ptr.vmem [resolvable:$true] %s51_s25 }
  0x17   :  { %p310_p9 = scmp.lt.u32.totalorder %s306_s28, %s434_s1 }
  0x19   :  { %p312_p10 = pnand %p310_p9, %p307_p8 }
  0x1b   :  { %315 = shalt.err (!%p312_p10)
}
  0x1c   :  { %s316_s5 = scalar_lea.vmem %s52_s25, 256  ;;  %s320_s0 = scalar_lea.vmem %s52_s25, 1024 }
  0x1d   :  { %p317_p11 = scmp.ne.s32.totalorder %s52_s25, %s316_s5  ;;  %p321_p12 = scmp.lt.s32.totalorder %s52_s25, %s52_s25 }
  0x1e   :  { %p322_p13 = scmp.lt.s32.totalorder %s320_s0, %s316_s5 }
  0x20   :  { %p323_p0 = por %p322_p13, %p321_p12 }
  0x22   :  { %p324_p1 = pnand %p323_p0, %p317_p11 }
  0x24   :  { %327 = shalt.err (!%p324_p1)
}
  0x25   :  { %57 = dma.hbm_to_vmem [thread:$0]  %s434_s1, 256, %s52_s25, [#allocation6], %s357_s20, %s357_s20, %s358_s21  }
  0x26   :  { %350 = dma.done.wait [#allocation3], 1024  }
  0x27   :  { %351 = vsyncadd [#allocation3], 4294966272 }
  0x28   :  { %352 = dma.done.wait [#allocation6], 1024  }
  0x29   :  { %353 = vsyncadd [#allocation6], 4294966272  ;;  %v124_v0 = vlaneseq  ;;  %v360_v1 = vmov 1983009808   ;;  %v90_v3 = vld [vmem:[#allocation2] sm:$0xff]  ;;  %v92_v4 = vld [vmem:[#allocation2 + $0x10] sm:$0xff] }
  0x2a   :  { %v142_v2 = vunpack.c.l.s4 %v360_v1  ;;  %v94_v5 = vld [vmem:[#allocation2 + $0x20] sm:$0xff]  ;;  %v96_v8 = vld [vmem:[#allocation2 + $0x30] sm:$0xff]  ;;  %v91_v15 = vld [vmem:[#allocation2 + $0x8] sm:$0xff]  ;;  %s361_s1 = smov [#allocation7]  }
  0x2b   :  { %v401_v6 = vshrl.u32 %v124_v0, 7  ;;  %v98_v9 = vld [vmem:[#allocation5] sm:$0xff]  ;;  %v100_v10 = vld [vmem:[#allocation5 + $0x10] sm:$0xff]  ;;  %v93_v18 = vld [vmem:[#allocation2 + $0x18] sm:$0xff]  ;;  %s263_s8 = sshll.u32 %s361_s1, 4  ;;  %s264_s8 = int_to_ptr.vmem [resolvable:$true] %s263_s8 }
  0x2c   :  { %v143_v7 = vunpack.c.0.s8 %v142_v2  ;;  %v102_v11 = vld [vmem:[#allocation5 + $0x20] sm:$0xff]  ;;  %v104_v12 = vld [vmem:[#allocation5 + $0x30] sm:$0xff]  ;;  %v106_v13 = vsub.f32 %v90_v3, %v98_v9  ;;  %v108_v14 = vsub.f32 %v92_v4, %v100_v10  ;;  %v95_v19 = vld [vmem:[#allocation2 + $0x28] sm:$0xff]  ;;  %s328_s9 = scalar_lea.vmem %s264_s8, 1024  ;;  %p333_p3 = scmp.lt.s32.totalorder %s264_s8, %s264_s8 }
  0x2d   :  { %v110_v16 = vsub.f32 %v94_v5, %v102_v11  ;;  %v112_v17 = vsub.f32 %v96_v8, %v104_v12  ;;  %v97_v20 = vld [vmem:[#allocation2 + $0x38] sm:$0xff]  ;;  %v99_v24 = vld [vmem:[#allocation5 + $0x8] sm:$0xff]  ;;  %vm128_vm0 = vcmp.lt.s32.totalorder %v401_v6, 2  ;;  %p329_p2 = scmp.ne.s32.totalorder %s264_s8, %s328_s9  ;;  %p334_p4 = scmp.lt.s32.totalorder %s328_s9, %s328_s9 }
  0x2e   :  { %v114_v21 = vmul.f32 %v106_v13, %v106_v13  ;;  %v116_v22 = vmul.f32 %v108_v14, %v108_v14  ;;  %v146_v23 = vsub.s32 %v143_v7, %v401_v6  ;;  %v101_v25 = vld [vmem:[#allocation5 + $0x18] sm:$0xff]  ;;  %v103_v26 = vld [vmem:[#allocation5 + $0x28] sm:$0xff]  ;;  %v107_v30 = vsub.f32 %v91_v15, %v99_v24 }
  0x2f   :  { %v118_v27 = vmul.f32 %v110_v16, %v110_v16  ;;  %v120_v28 = vmul.f32 %v112_v17, %v112_v17  ;;  %v105_v29 = vld [vmem:[#allocation5 + $0x38] sm:$0xff]  ;;  %v109_v31 = vsub.f32 %v93_v18, %v101_v25  ;;  %v111_v34 = vsub.f32 %v95_v19, %v103_v26  ;;  %p335_p5 = por %p334_p4, %p333_p3 }
  0x30   :  { %v137_v32 = vcombine.low %v114_v21, %v116_v22  ;;  %v138_v33 = vcombine.high %v114_v21, %v116_v22  ;;  %v113_v35 = vsub.f32 %v97_v20, %v105_v29  ;;  %v115_v38 = vmul.f32 %v107_v30, %v107_v30 }
  0x31   :  { %v139_v36 = vcombine.low %v118_v27, %v120_v28  ;;  %v140_v37 = vcombine.high %v118_v27, %v120_v28  ;;  %v117_v39 = vmul.f32 %v109_v31, %v109_v31  ;;  %v119_v42 = vmul.f32 %v111_v34, %v111_v34  ;;  %p336_p6 = pnand %p335_p5, %p329_p2 }
  0x32   :  { %v147_v40 = vrot.slane %v137_v32, %v146_v23  ;;  %v154_v41 = vrot.slane %v138_v33, %v146_v23  ;;  %v121_v43 = vmul.f32 %v113_v35, %v113_v35 }
  0x33   :  { %v161_v44 = vrot.slane %v139_v36, %v146_v23  ;;  %v168_v45 = vrot.slane %v140_v37, %v146_v23  ;;  %v173_v46 = vcombine.low %v115_v38, %v117_v39  ;;  %v174_v47 = vcombine.high %v115_v38, %v117_v39 }
  0x34   :  { %v175_v48 = vcombine.low %v119_v42, %v121_v43  ;;  %v176_v49 = vcombine.high %v119_v42, %v121_v43 }
  0x35   :  { %v169_v50 = vcombine.low %v147_v40, %v161_v44  ;;  %v170_v51 = vcombine.high %v147_v40, %v161_v44  ;;  %v171_v52 = vcombine.low %v154_v41, %v168_v45  ;;  %v172_v53 = vcombine.high %v154_v41, %v168_v45 }
  0x36   :  { %v183_v54 = vrot.slane %v173_v46, %v146_v23  ;;  %v197_v55 = vrot.slane %v175_v48, %v146_v23  ;;  %v190_v56 = vrot.slane %v174_v47, %v146_v23  ;;  %v204_v57 = vrot.slane %v176_v49, %v146_v23 }
  0x37   :  { %v217_v58 = vsel %vm128_vm0, %v169_v50, 0.0  ;;  %v218_v59 = vsel %vm128_vm0, %v170_v51, 0.0  ;;  %v219_v60 = vsel %vm128_vm0, %v171_v52, 0.0  ;;  %v220_v61 = vsel %vm128_vm0, %v172_v53, 0.0 }
  0x38   :  { %v205_v62 = vcombine.low %v183_v54, %v197_v55  ;;  %v206_v63 = vcombine.high %v183_v54, %v197_v55  ;;  %v207_v0 = vcombine.low %v190_v56, %v204_v57  ;;  %v208_v1 = vcombine.high %v190_v56, %v204_v57  ;;  %249 = vst [vmem:[#allocation7] sm:$0xff] %v217_v58 }
  0x39   :  { %250 = vst [vmem:[#allocation7 + $0x8] sm:$0xff] %v218_v59  ;;  %251 = vst [vmem:[#allocation7 + $0x10] sm:$0xff] %v219_v60 }
  0x3a   :  { %252 = vst [vmem:[#allocation7 + $0x18] sm:$0xff] %v220_v61  ;;  %v221_v2 = vsel %vm128_vm0, %v205_v62, 0.0  ;;  %v222_v3 = vsel %vm128_vm0, %v206_v63, 0.0  ;;  %v223_v4 = vsel %vm128_vm0, %v207_v0, 0.0  ;;  %v224_v5 = vsel %vm128_vm0, %v208_v1, 0.0 }
  0x3b   :  { %253 = vst [vmem:[#allocation7 + $0x20] sm:$0xff] %v221_v2  ;;  %254 = vst [vmem:[#allocation7 + $0x28] sm:$0xff] %v222_v3 }
  0x3c   :  { %255 = vst [vmem:[#allocation7 + $0x30] sm:$0xff] %v223_v4  ;;  %256 = vst [vmem:[#allocation7 + $0x38] sm:$0xff] %v224_v5 }
  0x3d   :  { %339 = shalt.err (!%p336_p6)
}
  0x3e   :  { %s340_s12 = scalar_lea.hbm %s435_s2, 1024 }
  0x3f   :  { %p341_p7 = scmp.ne.s32.totalorder %s435_s2, %s340_s12  ;;  %p344_p8 = scmp.lt.u32.totalorder %s340_s12, %s435_s2 }
  0x41   :  { %p346_p9 = pnand %p344_p8, %p341_p7 }
  0x43   :  { %349 = shalt.err (!%p346_p9)
}
  0x44   :  { %266 = dma.vmem_to_hbm [thread:$0]  %s264_s8, 1024, %s435_s2, [#allocation4]  }
  0x45   :  { %354 = dma.done.wait [#allocation4], 1024  }
  0x46   :  { %355 = vsyncadd [#allocation4], 4294966272 }
  0x47   :  { %270 = vsyncpa [#allocation3], 1 }
  0x48   :  { %271 = vsyncpa [#allocation6], 1 }
  0x49   :  { %272 = vsyncpa [#allocation4], 1 }

</bundles_post_ra>
